<compile_context>
chip_gen: v6e
topology: v6e:2x2x1
jax: 0.10.0
libtpu: 0.0.40
codegen_flags: <defaults>
</compile_context>

<pallas_src>
import functools
import math

import jax
import jax.numpy as jnp
from jax import lax
from jax.experimental import pallas as pl
from jax.experimental.pallas import tpu as pltpu


def _aam_softmax_kernel(label_ref, tgt_ref, cos_ref, loss_rows_ref,
                        correct_rows_ref, m_ref, l_ref, *, s, block_c):
    c_idx = pl.program_id(1)
    num_c = pl.num_programs(1)

    @pl.when(c_idx == 0)
    def _():
        m_ref[...] = jnp.full_like(m_ref, -jnp.inf)
        l_ref[...] = jnp.zeros_like(l_ref)

    cosine = cos_ref[...].astype(jnp.float32)              # [TB, TC]
    tb, tc = cosine.shape

    # one-hot mask via LOCAL column ids vs per-row (label - tile offset)
    lbl_local = label_ref[...] - c_idx * block_c            # [TB, 1]
    col = lax.broadcasted_iota(jnp.int32, (tb, tc), 1)       # [TB, TC]
    mask = col == lbl_local                                  # [TB, TC]

    tgt = tgt_ref[...]                                       # [TB, 1] = s * phi(target)
    logits = jnp.where(mask, tgt, cosine * s)                # substituted + scaled

    # --- online log-sum-exp across the C tiles ---
    m_prev = m_ref[...]
    tile_max = jnp.max(logits, axis=1, keepdims=True)
    m_new = jnp.maximum(m_prev, tile_max)
    l_ref[...] = (l_ref[...] * jnp.exp(m_prev - m_new)
                  + jnp.sum(jnp.exp(logits - m_new), axis=1, keepdims=True))
    m_ref[...] = m_new

    @pl.when(c_idx == num_c - 1)
    def _():
        lse = m_ref[...] + jnp.log(l_ref[...])
        loss_rows_ref[...] = lse - tgt
        # the target logit is one of the logits folded into the running max, so
        # m >= tgt always; prediction == label  <=>  global max == target logit.
        # (Exact-float-tie semantics differ from argmax-first-index; acceptable.)
        correct_rows_ref[...] = (tgt >= m_ref[...]).astype(jnp.float32)


def _round_up(x, m):
    return (x + m - 1) // m * m


def _tpu_vmem_bytes():
    try:
        return int(pltpu.get_tpu_info().vmem_capacity_bytes)
    except Exception:
        return None


def aam_softmax_forward(cosine, label, *, margin=0.2, scale=20.0, easy_margin=False,
                        block_b=None, block_c=None):
    """cosine: [B, nClasses] float (f32 or bf16), label: [B] int -> (loss, prec)."""
    B, C = cosine.shape
    assert label.shape[0] == B
    label2d = label.reshape(B, 1).astype(jnp.int32)
    s = float(scale)

    # ---- hoisted O(B) target-logit computation (gather + angular margin math) ----
    cos_m, sin_m = math.cos(margin), math.sin(margin)
    th = math.cos(math.pi - margin)
    mm = math.sin(math.pi - margin) * margin
    cos_t = jnp.take_along_axis(cosine.astype(jnp.float32), label2d, axis=1)   # [B,1]
    sin_t = jnp.sqrt(jnp.clip(1.0 - cos_t * cos_t, 0.0, 1.0))
    phi_t = cos_t * cos_m - sin_t * sin_m
    if easy_margin:
        phi_t = jnp.where(cos_t > 0.0, phi_t, cos_t)
    else:
        phi_t = jnp.where(cos_t - th > 0.0, phi_t, cos_t - mm)
    tgt_logit = (phi_t * s).astype(jnp.float32)                                # [B,1]

    # ---- block selection ----
    vmem_cap = _tpu_vmem_bytes()
    # v7x signature: 64 MiB VMEM per TC (and ~3.2 TB/s HBM) -> larger tiles to
    # amortize the ~0.35us per-grid-step overhead; v5e/v6e keep ~2 MiB tiles.
    preferred_c = 4096 if (vmem_cap is not None and vmem_cap <= (64 << 20)) else 2048
    sub = 16 if cosine.dtype == jnp.bfloat16 else 8          # bf16 packs (16,128)

    if block_b is None:
        if B >= 2 * sub:
            # aim for nb >= 2 so megacore (v7x) can shard the "parallel" B axis
            block_b = min(256, _round_up((B + 1) // 2, sub))
        else:
            block_b = _round_up(B, sub)
    if block_c is None:
        block_c = min(preferred_c, _round_up(C, 128))
    assert block_b % sub == 0, "block_b must be a multiple of the sublane packing"
    assert block_c % 128 == 0, "block_c must be a multiple of 128 lanes"

    # ---- pad to block multiples (cols: -1e9 pre-scale, rows: zeros) ----
    B_pad = _round_up(B, block_b)
    C_pad = _round_up(C, block_c)
    cos_p, lab_p, tgt_p = cosine, label2d, tgt_logit
    if C_pad != C:
        cos_p = jnp.pad(cos_p, ((0, 0), (0, C_pad - C)), constant_values=-1e9)
    if B_pad != B:
        cos_p = jnp.pad(cos_p, ((0, B_pad - B), (0, 0)))
        lab_p = jnp.pad(lab_p, ((0, B_pad - B), (0, 0)))
        tgt_p = jnp.pad(tgt_p, ((0, B_pad - B), (0, 0)))

    nb, nc = B_pad // block_b, C_pad // block_c

    # ---- VMEM budget: enough for double-buffered tiles, capped below physical ----
    tile_bytes = block_b * block_c * cosine.dtype.itemsize
    want = 4 * tile_bytes + (8 << 20)
    cap = int(vmem_cap * 0.8) if vmem_cap is not None else (56 << 20)
    vmem_limit = int(min(max(want, 32 << 20), cap))

    kernel = functools.partial(_aam_softmax_kernel, s=s, block_c=block_c)

    grid_spec = pltpu.PrefetchScalarGridSpec(
        num_scalar_prefetch=0,
        grid=(nb, nc),
        in_specs=[
            pl.BlockSpec((block_b, 1), lambda b, c: (b, 0)),          # label
            pl.BlockSpec((block_b, 1), lambda b, c: (b, 0)),          # s*phi(target)
            pl.BlockSpec((block_b, block_c), lambda b, c: (b, c)),    # cosine tile
        ],
        out_specs=(
            pl.BlockSpec((block_b, 1), lambda b, c: (b, 0)),          # per-row loss
            pl.BlockSpec((block_b, 1), lambda b, c: (b, 0)),          # per-row correct
        ),
        scratch_shapes=[
            pltpu.VMEM((block_b, 1), jnp.float32),   # running max
            pltpu.VMEM((block_b, 1), jnp.float32),   # running sum of exp
        ],
    )

    loss_rows, correct_rows = pl.pallas_call(
        kernel,
        out_shape=(
            jax.ShapeDtypeStruct((B_pad, 1), jnp.float32),
            jax.ShapeDtypeStruct((B_pad, 1), jnp.float32),
        ),
        grid_spec=grid_spec,
        compiler_params=pltpu.CompilerParams(
            dimension_semantics=("parallel", "arbitrary"),
            vmem_limit_bytes=vmem_limit),
    )(lab_p, tgt_p, cos_p)

    loss = jnp.sum(loss_rows[:B, 0]) * (1.0 / B)
    prec = jnp.sum(correct_rows[:B, 0]) * (1.0 / B)
    return loss, prec


def _reference(cosine, label, *, margin=0.2, scale=20.0, easy_margin=False):
    cos_m = math.cos(margin); sin_m = math.sin(margin)
    th = math.cos(math.pi - margin); mm = math.sin(math.pi - margin) * margin
    cosine = cosine.astype(jnp.float32)
    sine = jnp.sqrt(jnp.clip(1.0 - cosine * cosine, 0.0, 1.0))
    phi = cosine * cos_m - sine * sin_m
    if easy_margin:
        phi = jnp.where(cosine > 0, phi, cosine)
    else:
        phi = jnp.where(cosine - th > 0, phi, cosine - mm)
    one_hot = jax.nn.one_hot(label, cosine.shape[1], dtype=jnp.float32)
    output = (one_hot * phi + (1.0 - one_hot) * cosine) * scale
    logp = jax.nn.log_softmax(output, axis=1)
    loss = -jnp.mean(jnp.sum(one_hot * logp, axis=1))
    prec = jnp.mean((jnp.argmax(output, axis=1) == label).astype(jnp.float32))
    return loss, prec


if __name__ == "__main__":
    # nOut (embedding dim) is unused in forward; the module consumes cosine directly.
    key = jax.random.PRNGKey(0)

    # --- case 1: aligned shapes, default blocking (nb>=2, single C tile) ---
    B, nClasses = 16, 512
    k_cos, k_lab, k2_cos, k2_lab = jax.random.split(key, 4)
    cosine = jax.random.uniform(k_cos, (B, nClasses), jnp.float32, -1.0, 1.0)
    label = jax.random.randint(k_lab, (B,), 0, nClasses, jnp.int32)

    loss, prec = aam_softmax_forward(cosine, label, margin=0.2, scale=20.0)
    loss, prec = jax.block_until_ready(loss), jax.block_until_ready(prec)
    ref_loss, ref_prec = _reference(cosine, label, margin=0.2, scale=20.0)
    assert abs(float(loss) - float(ref_loss)) < 1e-3, (loss, ref_loss)
    assert abs(float(prec) - float(ref_prec)) < 1e-6, (prec, ref_prec)

    # --- case 2: small explicit blocks to exercise the streaming LSE over C tiles ---
    loss2, prec2 = aam_softmax_forward(cosine, label, margin=0.2, scale=20.0,
                                       block_b=8, block_c=128)
    loss2 = jax.block_until_ready(loss2)
    assert abs(float(loss2) - float(ref_loss)) < 1e-3, (loss2, ref_loss)
    assert abs(float(prec2) - float(ref_prec)) < 1e-6, (prec2, ref_prec)

    # --- case 3: unaligned B / C to exercise the padding path ---
    B3, C3 = 10, 500
    cosine3 = jax.random.uniform(k2_cos, (B3, C3), jnp.float32, -1.0, 1.0)
    label3 = jax.random.randint(k2_lab, (B3,), 0, C3, jnp.int32)
    loss3, prec3 = aam_softmax_forward(cosine3, label3, margin=0.2, scale=20.0)
    loss3 = jax.block_until_ready(loss3)
    ref_loss3, ref_prec3 = _reference(cosine3, label3, margin=0.2, scale=20.0)
    assert abs(float(loss3) - float(ref_loss3)) < 1e-3, (loss3, ref_loss3)
    assert abs(float(prec3) - float(ref_prec3)) < 1e-6, (prec3, ref_prec3)

    print("KERNEL_OK")
</pallas_src>

<mosaic_0001>
module attributes {stable_mosaic.version = 11 : i64} {
  func.func @_aam_softmax_kernel(%arg0: i32, %arg1: i32, %arg2: memref<8x1xi32, #tpu.memory_space<vmem>>, %arg3: memref<8x1xf32, #tpu.memory_space<vmem>>, %arg4: memref<8x512xf32, #tpu.memory_space<vmem>>, %arg5: memref<8x1xf32, #tpu.memory_space<vmem>>, %arg6: memref<8x1xf32, #tpu.memory_space<vmem>>, %arg7: memref<8x1xf32, #tpu.memory_space<vmem>>, %arg8: memref<8x1xf32, #tpu.memory_space<vmem>>) attributes {dimension_semantics = [#tpu.dimension_semantics<parallel>, #tpu.dimension_semantics<arbitrary>], iteration_bounds = array<i64: 2, 1>, scalar_prefetch = 0 : i64, scratch_operands = 2 : i64, tpu.core_type = #tpu.core_type<tc>, window_params = [{transform_indices = @transform_0, window_bounds = array<i64: 8, 1>}, {transform_indices = @transform_1, window_bounds = array<i64: 8, 1>}, {transform_indices = @transform_2, window_bounds = array<i64: 8, 512>}, {transform_indices = @transform_3, window_bounds = array<i64: 8, 1>}, {transform_indices = @transform_4, window_bounds = array<i64: 8, 1>}]} {
    %c0_i32 = arith.constant 0 : i32
    %0 = arith.cmpi eq, %arg1, %c0_i32 : i32
    %1 = arith.extui %0 : i1 to i32
    %c0_i32_0 = arith.constant 0 : i32
    %2 = arith.cmpi ne, %1, %c0_i32_0 : i32
    scf.if %2 {
      %cst_18 = arith.constant 0xFF800000 : f32
      %36 = vector.broadcast %cst_18 : f32 to vector<8x1xf32>
      %c0_19 = arith.constant 0 : index
      %c0_20 = arith.constant 0 : index
      %37 = vector.load %arg7[%c0_19, %c0_20] : memref<8x1xf32, #tpu.memory_space<vmem>>, vector<8x1xf32>
      tpu.vector_store %arg7[%c0_19, %c0_20], %36 {strides = array<i32>} : memref<8x1xf32, #tpu.memory_space<vmem>>, vector<8x1xf32>,
      %cst_21 = arith.constant 0.000000e+00 : f32
      %38 = vector.broadcast %cst_21 : f32 to vector<8x1xf32>
      %c0_22 = arith.constant 0 : index
      %c0_23 = arith.constant 0 : index
      %39 = vector.load %arg8[%c0_22, %c0_23] : memref<8x1xf32, #tpu.memory_space<vmem>>, vector<8x1xf32>
      tpu.vector_store %arg8[%c0_22, %c0_23], %38 {strides = array<i32>} : memref<8x1xf32, #tpu.memory_space<vmem>>, vector<8x1xf32>,
    } else {
    }
    %c0 = arith.constant 0 : index
    %c0_1 = arith.constant 0 : index
    %3 = vector.load %arg4[%c0, %c0_1] : memref<8x512xf32, #tpu.memory_space<vmem>>, vector<8x512xf32>
    %c0_2 = arith.constant 0 : index
    %c0_3 = arith.constant 0 : index
    %4 = vector.load %arg2[%c0_2, %c0_3] : memref<8x1xi32, #tpu.memory_space<vmem>>, vector<8x1xi32>
    %c512_i32 = arith.constant 512 : i32
    %5 = arith.muli %arg1, %c512_i32 : i32
    %6 = vector.broadcast %5 : i32 to vector<8x1xi32>
    %7 = arith.subi %4, %6 : vector<8x1xi32>
    %8 = tpu.iota {dimensions = array<i32: 1>} : vector<8x512xi32>
    %9 = vector.broadcast %7 : vector<8x1xi32> to vector<8x512xi32>
    %10 = arith.cmpi eq, %8, %9 : vector<8x512xi32>
    %c0_4 = arith.constant 0 : index
    %c0_5 = arith.constant 0 : index
    %11 = vector.load %arg3[%c0_4, %c0_5] : memref<8x1xf32, #tpu.memory_space<vmem>>, vector<8x1xf32>
    %cst = arith.constant 2.000000e+01 : f32
    %12 = vector.broadcast %cst : f32 to vector<8x512xf32>
    %13 = arith.mulf %3, %12 : vector<8x512xf32>
    %14 = vector.shape_cast %11 : vector<8x1xf32> to vector<8x1xf32>
    %15 = vector.broadcast %14 : vector<8x1xf32> to vector<8x512xf32>
    %16 = arith.select %10, %15, %13 : vector<8x512xi1>, vector<8x512xf32>
    %c0_6 = arith.constant 0 : index
    %c0_7 = arith.constant 0 : index
    %17 = vector.load %arg7[%c0_6, %c0_7] : memref<8x1xf32, #tpu.memory_space<vmem>>, vector<8x1xf32>
    %cst_8 = arith.constant dense<0xFF800000> : vector<8xf32>
    %18 = vector.multi_reduction <maximumf>, %16, %cst_8 [1] : vector<8x512xf32> to vector<8xf32>
    %19 = vector.shape_cast %18 : vector<8xf32> to vector<8x1xf32>
    %20 = arith.maximumf %17, %19 : vector<8x1xf32>
    %c0_9 = arith.constant 0 : index
    %c0_10 = arith.constant 0 : index
    %21 = vector.load %arg8[%c0_9, %c0_10] : memref<8x1xf32, #tpu.memory_space<vmem>>, vector<8x1xf32>
    %22 = arith.subf %17, %20 : vector<8x1xf32>
    %23 = math.exp %22 : vector<8x1xf32>
    %24 = arith.mulf %21, %23 : vector<8x1xf32>
    %25 = vector.broadcast %20 : vector<8x1xf32> to vector<8x512xf32>
    %26 = arith.subf %16, %25 : vector<8x512xf32>
    %27 = math.exp %26 : vector<8x512xf32>
    %cst_11 = arith.constant dense<0.000000e+00> : vector<8xf32>
    %28 = vector.multi_reduction <add>, %27, %cst_11 [1] : vector<8x512xf32> to vector<8xf32>
    %29 = vector.shape_cast %28 : vector<8xf32> to vector<8x1xf32>
    %30 = arith.addf %24, %29 : vector<8x1xf32>
    %c0_12 = arith.constant 0 : index
    %c0_13 = arith.constant 0 : index
    %31 = vector.load %arg8[%c0_12, %c0_13] : memref<8x1xf32, #tpu.memory_space<vmem>>, vector<8x1xf32>
    tpu.vector_store %arg8[%c0_12, %c0_13], %30 {strides = array<i32>} : memref<8x1xf32, #tpu.memory_space<vmem>>, vector<8x1xf32>,
    %c0_14 = arith.constant 0 : index
    %c0_15 = arith.constant 0 : index
    %32 = vector.load %arg7[%c0_14, %c0_15] : memref<8x1xf32, #tpu.memory_space<vmem>>, vector<8x1xf32>
    tpu.vector_store %arg7[%c0_14, %c0_15], %20 {strides = array<i32>} : memref<8x1xf32, #tpu.memory_space<vmem>>, vector<8x1xf32>,
    %c0_i32_16 = arith.constant 0 : i32
    %33 = arith.cmpi eq, %arg1, %c0_i32_16 : i32
    %34 = arith.extui %33 : i1 to i32
    %c0_i32_17 = arith.constant 0 : i32
    %35 = arith.cmpi ne, %34, %c0_i32_17 : i32
    scf.if %35 {
      %c0_18 = arith.constant 0 : index
      %c0_19 = arith.constant 0 : index
      %36 = vector.load %arg7[%c0_18, %c0_19] : memref<8x1xf32, #tpu.memory_space<vmem>>, vector<8x1xf32>
      %c0_20 = arith.constant 0 : index
      %c0_21 = arith.constant 0 : index
      %37 = vector.load %arg8[%c0_20, %c0_21] : memref<8x1xf32, #tpu.memory_space<vmem>>, vector<8x1xf32>
      %38 = math.log %37 : vector<8x1xf32>
      %39 = arith.addf %36, %38 : vector<8x1xf32>
      %40 = arith.subf %39, %11 : vector<8x1xf32>
      %c0_22 = arith.constant 0 : index
      %c0_23 = arith.constant 0 : index
      %41 = vector.load %arg5[%c0_22, %c0_23] : memref<8x1xf32, #tpu.memory_space<vmem>>, vector<8x1xf32>
      tpu.vector_store %arg5[%c0_22, %c0_23], %40 {strides = array<i32>} : memref<8x1xf32, #tpu.memory_space<vmem>>, vector<8x1xf32>,
      %c0_24 = arith.constant 0 : index
      %c0_25 = arith.constant 0 : index
      %42 = vector.load %arg7[%c0_24, %c0_25] : memref<8x1xf32, #tpu.memory_space<vmem>>, vector<8x1xf32>
      %43 = arith.cmpf oge, %11, %42 : vector<8x1xf32>
      %44 = arith.extui %43 : vector<8x1xi1> to vector<8x1xi32>
      %45 = arith.sitofp %44 : vector<8x1xi32> to vector<8x1xf32>
      %c0_26 = arith.constant 0 : index
      %c0_27 = arith.constant 0 : index
      %46 = vector.load %arg6[%c0_26, %c0_27] : memref<8x1xf32, #tpu.memory_space<vmem>>, vector<8x1xf32>
      tpu.vector_store %arg6[%c0_26, %c0_27], %45 {strides = array<i32>} : memref<8x1xf32, #tpu.memory_space<vmem>>, vector<8x1xf32>,
    } else {
    }
    return
  }
  func.func @transform_0(%arg0: i32, %arg1: i32) -> (i32, i32) {
    %c0_i32 = arith.constant 0 : i32
    %c0_i32_0 = arith.constant 0 : i32
    return %arg0, %c0_i32 : i32, i32
  }
  func.func @transform_1(%arg0: i32, %arg1: i32) -> (i32, i32) {
    %c0_i32 = arith.constant 0 : i32
    %c0_i32_0 = arith.constant 0 : i32
    return %arg0, %c0_i32 : i32, i32
  }
  func.func @transform_2(%arg0: i32, %arg1: i32) -> (i32, i32) {
    %c0_i32 = arith.constant 0 : i32
    return %arg0, %arg1 : i32, i32
  }
  func.func @transform_3(%arg0: i32, %arg1: i32) -> (i32, i32) {
    %c0_i32 = arith.constant 0 : i32
    %c0_i32_0 = arith.constant 0 : i32
    return %arg0, %c0_i32 : i32, i32
  }
  func.func @transform_4(%arg0: i32, %arg1: i32) -> (i32, i32) {
    %c0_i32 = arith.constant 0 : i32
    %c0_i32_0 = arith.constant 0 : i32
    return %arg0, %c0_i32 : i32, i32
  }
}

</mosaic_0001>

<bundles_post_ra>
// kernel: tpu_custom_call.1
= control target key start
LH: loop header
LB: loop body
LE: loop exit
PB: predicated region body
PF: predicated region fallthrough
CT: control target
= control target key end

     0   :  { %10 = vsyncpa [#allocation5], 0  ;;  %s825_s0 = inlined_call_operand.vmem [shape: s32[16,1], index: 0, kind: input, shape index: {}]   ;;  %s826_s1 = inlined_call_operand.vmem [shape: f32[16,1], index: 1, kind: input, shape index: {}]   ;;  %s827_s2 = inlined_call_operand.hbm [shape: f32[16,512], index: 2, kind: input, shape index: {}]   ;;  %s828_s3 = inlined_call_operand.vmem [shape: f32[16,1], index: 3, kind: output, shape index: {0}]   ;;  %s829_s4 = inlined_call_operand.vmem [shape: f32[16,1], index: 4, kind: output, shape index: {1}]  }
   0x1   :  { %12 = vsyncpa [#allocation5 + $0x1], 0  ;;  %s699_s15 = smov 0   ;;  %s701_s16 = smov 0  }
   0x2   :  { %s703_s17 = smov 0   ;;  %s705_s18 = smov 0  }
   0x3   :  { %s707_s19 = smov 0   ;;  %s709_s20 = smov 0  }
   0x4 LB: > { %s501_s21 = sadd.s32 4294967295, %s668_s20   ;;  %s30_s22 = sadd.s32 1, %s664_s19  ;;  %s668_s20 = sphi %s709_s20, %s18_s20   ;;  %s664_s19 = sphi %s707_s19, %s837_s19   ;;  %s660_s18 = sphi %s705_s18, %s836_s18   ;;  %s656_s17 = sphi %s703_s17, %s835_s17   ;;  %s652_s16 = sphi %s701_s16, %s834_s16   ;;  %s648_s15 = sphi %s699_s15, %s833_s15  }
   0x5   : > { %p32_p0 = scmp.ge.s32.totalorder %s30_s22, 2  ;;  %s91_s23 = sadd.s32 1, %s656_s17 }
   0x6   : > { %p98_p1 = scmp.ne.s32.totalorder %s656_s17, %s652_s16  ;;  %p99_p2 = scmp.eq.s32.totalorder %s668_s20, 0 }
   0x7   : > { %s839_s22 = smov (%p32_p0, %s30_s22), 0  ;;  %p104_p4 = scmp.ne.s32.totalorder %s652_s16, %s648_s15 }
   0x8   : > { %p735_p3 = por %p99_p2, %p98_p1  ;;  %s86_s25 = ssub.s32 %s664_s19, %s839_s22 }
   0x9   : > { %p105_p5 = scmp.eq.s32.totalorder %s501_s21, 0  ;;  %p89_p6 = scmp.eq.s32.totalorder %s86_s25, 0 }
   0xa   : > { %p524_p8 = scmp.lt.s32.totalorder %s668_s20, 2  ;;  %s194_s28 = sand.u32 1, %s656_s17  }
   0xb   : > { %p742_p7 = por %p105_p5, %p104_p4  ;;  %s517_s29 = sshll.u32 %s664_s19, 9 }
   0xc   : > { %s748_s27 = scalar_select %p89_p6, %s656_s17, %s91_s23  }
   0xd   : > { %s505_s30 = sshll.u32 %s194_s28, 5  ;;  %s206_s7 = scalar_lea.hbm %s827_s2, %s517_s29 }
   0xe   : > { %s198_s8 = scalar_lea.vmem [#allocation4], %s505_s30  ;;  %p757_p9 = pnand %p524_p8, %p735_p3 }
   0xf   : > { %s208_s9 = sshll.u32 %s198_s8, 4  ;;  %p508_p10 = scmp.ge.s32.totalorder %s668_s20, 1  ;;  %s209_s9 = int_to_ptr.vmem [resolvable:$true] %s208_s9 }
  0x10   : > { %p213_p11 = scmp.lt.s32.totalorder %s668_s20, 3  ;;  %s195_s11 = scalar_lea.sflag [#allocation5], %s194_s28 }
  0x11   : > { %p592_p12 = pneg %p757_p9  ;;  %s603_s12 = scalar_lea.vmem %s209_s9, 512 }
  0x12   : > { %p604_p13 = scmp.ne.s32.totalorder %s209_s9, %s603_s12  ;;  %s670_s13 = smov [#allocation4]  }
  0x13   : > { %s608_s14 = sshll.u32 %s670_s13, 4  ;;  %s609_s14 = int_to_ptr.vmem [resolvable:$false] %s608_s14 }
  0x14   : > { %p606_p0 = pnand %p604_p13, %p592_p12  ;;  %s610_s15 = scalar_lea.vmem %s609_s14, 1024 }
  0x15   : > { %p611_p2 = scmp.lt.s32.totalorder %s209_s9, %s609_s14  ;;  %p612_p3 = scmp.lt.s32.totalorder %s610_s15, %s603_s12 }
  0x16   : > { %p607_p1 = pneg %p606_p0 }
  0x17   : > { %p613_p4 = por %p612_p3, %p611_p2 }
  0x19   : > { %p614_p5 = pnand %p613_p4, %p607_p1 }
  0x1b   : > { %617 = shalt.err (!%p614_p5)
}
  0x1c   : > { %523 = dma.hbm_to_vmem [thread:$0]  (!%p757_p9), %s206_s7, 512, %s209_s9, %s195_s11  }
  0x1d   : > { %p214_p6 = pnand %p508_p10, %p213_p11 }
  0x1e   : > { %s219_s21 = sand.u32 (!%p214_p6), 1, %s652_s16  }
  0x1f   : > { %217 = sbr.rel (%p214_p6) target bundleno = 634 (0x27a), region = 32  ;;  %s509_s23 = sshll.u32 (!%p214_p6), %s219_s21, 5 }
  0x20   : > { %s220_s24 = scalar_lea.sflag (!%p214_p6), [#allocation5], %s219_s21  ;;  %s223_s25 = scalar_lea.vmem (!%p214_p6), [#allocation4], %s509_s23 }
  0x24   : > { %643 = dma.done.wait (%p742_p7), %s220_s24, 512  }
  0x25   : > { %645 = vsyncadd (%p742_p7), %s220_s24, 4294966784  ;;  %p259_p8 = scmp.lt.s32.totalorder %s660_s18, 1  ;;  %v671_v0 = vmov 0   ;;  %vm280_vm0 = vcmask 7168   ;;  %v672_v3 = vmov -inf   ;;  %v291_v4 = vlaneseq  ;;  %v283_v6 = vld [vmem:[%s223_s25] sm:$0xff] }
  0x26   : > { %576 = vset.pattern.permute.xlu0 %v671_v0  ;;  %577 = vset.pattern.permute.xlu1 %v671_v0  ;;  %281 = vst.msk [vmem:[#allocation2] sm:$0xff] %vm280_vm0, %v672_v3  ;;  %v284_v7 = vld [vmem:[%s223_s25 + $0x8] sm:$0xff]  ;;  %v285_v8 = vld [vmem:[%s223_s25 + $0x10] sm:$0xff]  ;;  %v286_v9 = vld [vmem:[%s223_s25 + $0x18] sm:$0xff]  ;;  %v304_v14 = vmul.f32 20.0, %v283_v6  ;;  %v673_v26 = vmov 0.0  }
  0x27   : > { %s841_s18 = smov (!%p259_p8, %s660_s18), 1  ;;  %v292_v5 = vand.u32 127, %v291_v4  ;;  %v305_v15 = vmul.f32 20.0, %v284_v7  ;;  %v306_v16 = vmul.f32 20.0, %v285_v8  ;;  %v307_v17 = vmul.f32 20.0, %v286_v9  ;;  %282 = vst.msk [vmem:[#allocation3] sm:$0xff] %vm280_vm0, %v673_v26 }
  0x28   : > { %s778_s28 = sshll.u32 %s841_s18, 3 }
  0x29   : > { %s262_s5 = scalar_lea.vmem %s825_s0, %s778_s28  ;;  %s266_s26 = scalar_lea.vmem %s826_s1, %s778_s28  ;;  %v293_v11 = vadd.s32 128, %v292_v5  ;;  %v294_v12 = vadd.s32 256, %v292_v5  ;;  %v295_v13 = vadd.s32 384, %v292_v5 }
  0x2a   : > { %v287_v1 = vld [vmem:[%s262_s5] sm:$0xff]  ;;  %s275_s9 = scalar_lea.vmem %s829_s4, %s778_s28  ;;  %s271_s12 = scalar_lea.vmem %s828_s3, %s778_s28 }
  0x2b   : > { %297 = vperm.xlu0 %576, %v287_v1   ;;  %v788_v2 = vld [vmem:[%s266_s26] sm:$0xff] }
  0x2d   : > { %v317_v27 = vld [vmem:[#allocation2] sm:$0xff] }
  0x2e   : > { %v324_v51 = vld [vmem:[#allocation3] sm:$0xff] }
  0x2f   : > { %310 = vperm.xlu0 %576, %v788_v2  }
  0xa6   : > { %v298_v10 = vpop.permute.xlu0 %297 }
  0xa7   : > { %vm299_vm1 = vcmp.eq.s32.totalorder %v292_v5, %v298_v10  ;;  %vm300_vm2 = vcmp.eq.s32.totalorder %v293_v11, %v298_v10  ;;  %vm301_vm3 = vcmp.eq.s32.totalorder %v294_v12, %v298_v10  ;;  %vm302_vm4 = vcmp.eq.s32.totalorder %v295_v13, %v298_v10 }
  0xaa   : > { %v311_v18 = vpop.permute.xlu0 %310 }
  0xab   : > { %v313_v19 = vsel %vm299_vm1, %v311_v18, %v304_v14  ;;  %v314_v20 = vsel %vm300_vm2, %v311_v18, %v305_v15  ;;  %v315_v21 = vsel %vm301_vm3, %v311_v18, %v306_v16  ;;  %v316_v22 = vsel %vm302_vm4, %v311_v18, %v307_v17 }
  0xac   : > { %v318_v23 = vmax.f32 %v313_v19, %v314_v20  ;;  %v319_v24 = vmax.f32 %v315_v21, %v316_v22 }
  0xae   : > { %v320_v25 = vmax.f32 %v318_v23, %v319_v24 }
  0xb0   : > { %321 = vmax.xlane.f32.xlu1 %v320_v25 }
 0x139   : > { %v322_v28 = vpop.xlane.xlu1 %321 }
 0x13a   : > { %v323_v29 = vmax.f32 %v317_v27, %v322_v28 }
 0x13c   : > { %v325_v30 = vsub.f32 %v317_v27, %v323_v29  ;;  %354 = vst.msk [vmem:[#allocation2] sm:$0xff] %vm280_vm0, %v323_v29  ;;  %331 = vperm.xlu1 %577, %v323_v29  }
 0x13e   : > { %v326_v49 = vmul.f32 1.442695, %v325_v30 }
 0x143   : > { %v358_v31 = vld [vmem:[#allocation2] sm:$0xff] }
 0x144   : > { %vm366_vm5 = vcmp.ge.f32.partialorder %v788_v2, %v358_v31 }
 0x145   : > { %v514_v32 = vsel %vm366_vm5, 1.0, %v673_v26 }
 0x146   : > { %369 = vst.msk [vmem:[%s275_s9] sm:$0xff] %vm280_vm0, %v514_v32 }
 0x1b7   : > { %v332_v33 = vpop.permute.xlu1 %331 }
 0x1b8   : > { %v334_v34 = vsub.f32 %v313_v19, %v332_v33  ;;  %v335_v35 = vsub.f32 %v314_v20, %v332_v33  ;;  %v336_v36 = vsub.f32 %v315_v21, %v332_v33  ;;  %v337_v37 = vsub.f32 %v316_v22, %v332_v33 }
 0x1ba   : > { %v338_v38 = vmul.f32 1.442695, %v334_v34  ;;  %v340_v39 = vmul.f32 1.442695, %v335_v35  ;;  %v342_v40 = vmul.f32 1.442695, %v336_v36 }
 0x1bb   : > { %v344_v41 = vmul.f32 1.442695, %v337_v37 }
 0x1bc   : > { %578 = vpow2.f32 %v338_v38 }
 0x1bd   : > { %580 = vpow2.f32 %v340_v39 }
 0x1be   : > { %582 = vpow2.f32 %v342_v40 }
 0x1bf   : > { %584 = vpow2.f32 %v344_v41 }
 0x1c0   : > { %586 = vpow2.f32 %v326_v49 }
 0x1c9   : > { %v579_v42 = vpop.eup %578 }
 0x1ca   : > { %v581_v43 = vpop.eup %580 }
 0x1cb   : > { %v346_v44 = vadd.f32 %v581_v43, %v579_v42  ;;  %v583_v45 = vpop.eup %582 }
 0x1cc   : > { %v585_v47 = vpop.eup %584 }
 0x1cd   : > { %v347_v46 = vadd.f32 %v583_v45, %v346_v44  ;;  %v587_v50 = vpop.eup %586 }
 0x1ce   : > { %v328_v52 = vmul.f32 %v587_v50, %v324_v51 }
 0x1cf   : > { %v348_v48 = vadd.f32 %v585_v47, %v347_v46 }
 0x1d1   : > { %349 = vadd.xlane.f32.xlu0 %v348_v48 }
 0x25a   : > { %v350_v53 = vpop.xlane.xlu0 %349 }
 0x25b   : > { %v351_v54 = vadd.f32 %v350_v53, %v328_v52 }
 0x25d   : > { %353 = vst.msk [vmem:[#allocation3] sm:$0xff] %vm280_vm0, %v351_v54 }
 0x264   : > { %v359_v55 = vld [vmem:[#allocation3] sm:$0xff] }
 0x265   : > { %588 = vlog2.f32 %v359_v55 }
 0x272   : > { %v589_v56 = vpop.eup %588 }
 0x273   : > { %v361_v57 = vmul.f32 0.6931472, %v589_v56 }
 0x275   : > { %v362_v58 = vadd.f32 %v361_v57, %v358_v31 }
 0x277   : > { %v363_v59 = vsub.f32 %v362_v58, %v788_v2 }
 0x279   : > { %364 = vst.msk [vmem:[%s271_s12] sm:$0xff] %vm280_vm0, %v363_v59 }
 0x27a PF: > { %s18_s20 = sadd.s32 1, %s668_s20   ;;  %s833_s15 = smov %s652_s16 }
 0x27b   : > { %p15_p7 = scmp.ge.s32.totalorder %s18_s20, 4   ;;  %s834_s16 = smov %s656_s17 }
 0x27c   : > { %s835_s17 = smov %s748_s27  ;;  %s836_s18 = smov %s664_s19 }
 0x27d   : > { %s837_s19 = smov %s839_s22  ;;  %17 = sbr.rel (!%p15_p7) target bundleno = 4 (0x4), region = 98 }
 0x282   :  { %403 = vsyncpa [#allocation5], 1 }
 0x283   :  { %405 = vsyncpa [#allocation5 + $0x1], 1 }

</bundles_post_ra>
